<compile_context>
chip_gen: v7x
topology: tpu7x:2x2x1
jax: 0.10.0
libtpu: 0.0.40
codegen_flags: <defaults>
</compile_context>

<pallas_src>
import jax
import jax.numpy as jnp
from jax.experimental import pallas as pl
from jax.experimental.pallas import tpu as pltpu


_TARGET_SLAB_BYTES = 2 * 1024 * 1024     # ~2 MiB per (tm, hw) f32 slab (sweet spot per roofline)
_VMEM_LIMIT_BYTES = 32 * 1024 * 1024     # safe scoped-VMEM limit on v5e / v6e / v7x


def _dfs_kernel(x_ref, prior_ref, theta_ref, out_ref):
    """Blocks are (tm, hw): rows on sublanes, spatial on lanes (reductions over lanes)."""
    p = prior_ref[...].astype(jnp.float32)            # (tm, hw)
    x = x_ref[...].astype(jnp.float32)                # (tm, hw)
    th = theta_ref[...].astype(jnp.float32)           # (tm, 1)
    hw = p.shape[-1]                                  # block last dim == full spatial size

    pmax = jnp.max(p, axis=-1, keepdims=True)         # (tm, 1)  XLU reduce
    e = jnp.exp(p - pmax)                             # (tm, hw) EUP
    den = jnp.sum(e, axis=-1, keepdims=True)          # (tm, 1)
    gmean = jnp.sum(p, axis=-1, keepdims=True) * (1.0 / hw)   # spatial mean, (tm, 1)

    # x * softmax(p) * (theta + mean)  ==  x * e * ((theta + mean) / den)
    scale = (th + gmean) / den                        # per-row divide only
    out_ref[...] = (x * e * scale).astype(out_ref.dtype)


def _pick_row_tile(rows, hw_pad):
    """Largest multiple-of-8 divisor of `rows` whose (tm, hw_pad) f32 slab is <= ~2 MiB."""
    cap = max(_TARGET_SLAB_BYTES // (hw_pad * 4), 8)
    if rows >= 16:
        cap = min(cap, rows // 2)          # keep >= 2 grid steps for the two v7x TensorCores
    tm = min(rows, cap)
    tm -= tm % 8
    while tm >= 8 and rows % tm:
        tm -= 8
    if tm < 8:
        tm = rows                          # full-dim block fallback (rows not a multiple of 8)
    return tm


def _dfs_single_impl(x, prior, theta_param):
    """One (x, prior, theta) triple. x, prior: (b, c, h, w); theta_param: (1, c, 1, 1)."""
    b, c, h, w = x.shape
    rows, hw = b * c, h * w

    # theta = clamp(sigmoid(theta_param) * 1.0 + 0.5, max=1)  -> one value per (b, c) row
    theta = jnp.minimum(jax.nn.sigmoid(theta_param.reshape(c).astype(jnp.float32)) + 0.5, 1.0)
    theta_rows = jnp.tile(theta, (b,)).reshape(rows, 1)       # row-major (b, c) order

    x2 = x.reshape(rows, hw)
    p2 = prior.reshape(rows, hw)

    hw_pad = -(-hw // 128) * 128                              # lane-padded width in VMEM
    tm = _pick_row_tile(rows, hw_pad)

    out = pl.pallas_call(
        _dfs_kernel,
        out_shape=jax.ShapeDtypeStruct((rows, hw), x.dtype),
        grid_spec=pltpu.PrefetchScalarGridSpec(
            num_scalar_prefetch=0,
            grid=(rows // tm,),
            in_specs=[
                pl.BlockSpec((tm, hw), lambda i: (i, 0)),     # x
                pl.BlockSpec((tm, hw), lambda i: (i, 0)),     # prior
                pl.BlockSpec((tm, 1), lambda i: (i, 0)),      # theta per row
            ],
            out_specs=pl.BlockSpec((tm, hw), lambda i: (i, 0)),
        ),
        compiler_params=pltpu.CompilerParams(
            dimension_semantics=("parallel",),
            vmem_limit_bytes=_VMEM_LIMIT_BYTES,
        ),
    )(x2, p2, theta_rows)
    return out.reshape(b, c, h, w)


dfs_single = jax.jit(_dfs_single_impl)


def dfs_forward(xs, priors, thetas):
    """Pallas implementation of DomainRelated_Feature_Selection.forward (conv=False)."""
    # TODO(synk): per-call launch overhead remains for tiny pyramid levels; fusing all levels
    # into one pallas_call would need ragged per-level hw handling and is not done here.
    return [dfs_single(x, p, th) for x, p, th in zip(xs, priors, thetas)]


def _reference_single(x, prior, theta_param):
    b, c, h, w = x.shape
    theta = jnp.minimum(jax.nn.sigmoid(theta_param) * 1.0 + 0.5, 1.0)   # (1, c, 1, 1)
    pf = prior.reshape(b, c, -1)
    pf_max = jnp.max(pf, axis=-1, keepdims=True)
    weights = jax.nn.softmax(pf - pf_max, axis=-1).reshape(b, c, h, w)
    global_inf = jnp.mean(prior, axis=(-2, -1), keepdims=True)
    return x * (weights * (theta + global_inf))


if __name__ == "__main__":
    key = jax.random.PRNGKey(0)
    num_channels = 4
    b, hw0 = 2, 16

    # Typical 3-scale pyramid implied by theta1/theta2/theta3 channel counts.
    shapes = [
        (b, num_channels, hw0, hw0),                 # theta1 (1, C, 1, 1)
        (b, num_channels * 2, hw0 // 2, hw0 // 2),   # theta2 (1, 2C, 1, 1)
        (b, num_channels * 4, hw0 // 4, hw0 // 4),   # theta3 (1, 4C, 1, 1)
    ]

    keys = jax.random.split(key, 2 * len(shapes))
    xs = [jax.random.normal(keys[2 * i], s, dtype=jnp.float32) for i, s in enumerate(shapes)]
    priors = [jax.random.normal(keys[2 * i + 1], s, dtype=jnp.float32) for i, s in enumerate(shapes)]

    # Parameters initialized exactly as in __init__: zeros.
    thetas = [
        jnp.zeros((1, num_channels, 1, 1), jnp.float32),
        jnp.zeros((1, num_channels * 2, 1, 1), jnp.float32),
        jnp.zeros((1, num_channels * 4, 1, 1), jnp.float32),
    ]

    outs = dfs_forward(xs, priors, thetas)
    outs = [jax.block_until_ready(o) for o in outs]

    # Correctness vs pure-JAX reference (exact f32 math in the kernel; only rounding differs).
    for o, x, p, th in zip(outs, xs, priors, thetas):
        ref = _reference_single(x, p, th)
        assert o.shape == ref.shape
        assert jnp.max(jnp.abs(o - ref)) < 1e-4, "mismatch vs reference"

    print("KERNEL_OK")
</pallas_src>

<mosaic_0001>
module attributes {stable_mosaic.version = 11 : i64} {
  func.func @_dfs_kernel(%arg0: i32, %arg1: memref<8x256xf32, #tpu.memory_space<vmem>>, %arg2: memref<8x256xf32, #tpu.memory_space<vmem>>, %arg3: memref<8x1xf32, #tpu.memory_space<vmem>>, %arg4: memref<8x256xf32, #tpu.memory_space<vmem>>) attributes {dimension_semantics = [#tpu.dimension_semantics<parallel>], iteration_bounds = array<i64: 1>, scalar_prefetch = 0 : i64, scratch_operands = 0 : i64, tpu.core_type = #tpu.core_type<tc>, window_params = [{transform_indices = @transform_0, window_bounds = array<i64: 8, 256>}, {transform_indices = @transform_1, window_bounds = array<i64: 8, 256>}, {transform_indices = @transform_2, window_bounds = array<i64: 8, 1>}, {transform_indices = @transform_3, window_bounds = array<i64: 8, 256>}]} {
    %c0 = arith.constant 0 : index
    %c0_0 = arith.constant 0 : index
    %0 = vector.load %arg2[%c0, %c0_0] : memref<8x256xf32, #tpu.memory_space<vmem>>, vector<8x256xf32>
    %c0_1 = arith.constant 0 : index
    %c0_2 = arith.constant 0 : index
    %1 = vector.load %arg1[%c0_1, %c0_2] : memref<8x256xf32, #tpu.memory_space<vmem>>, vector<8x256xf32>
    %c0_3 = arith.constant 0 : index
    %c0_4 = arith.constant 0 : index
    %2 = vector.load %arg3[%c0_3, %c0_4] : memref<8x1xf32, #tpu.memory_space<vmem>>, vector<8x1xf32>
    %cst = arith.constant dense<0xFF800000> : vector<8xf32>
    %3 = vector.multi_reduction <maximumf>, %0, %cst [1] : vector<8x256xf32> to vector<8xf32>
    %4 = vector.shape_cast %3 : vector<8xf32> to vector<8x1xf32>
    %5 = vector.broadcast %4 : vector<8x1xf32> to vector<8x256xf32>
    %6 = arith.subf %0, %5 : vector<8x256xf32>
    %7 = math.exp %6 : vector<8x256xf32>
    %cst_5 = arith.constant dense<0.000000e+00> : vector<8xf32>
    %8 = vector.multi_reduction <add>, %7, %cst_5 [1] : vector<8x256xf32> to vector<8xf32>
    %9 = vector.shape_cast %8 : vector<8xf32> to vector<8x1xf32>
    %cst_6 = arith.constant dense<0.000000e+00> : vector<8xf32>
    %10 = vector.multi_reduction <add>, %0, %cst_6 [1] : vector<8x256xf32> to vector<8xf32>
    %11 = vector.shape_cast %10 : vector<8xf32> to vector<8x1xf32>
    %cst_7 = arith.constant 3.906250e-03 : f32
    %12 = vector.broadcast %cst_7 : f32 to vector<8x1xf32>
    %13 = arith.mulf %11, %12 : vector<8x1xf32>
    %14 = arith.addf %2, %13 : vector<8x1xf32>
    %15 = arith.divf %14, %9 : vector<8x1xf32>
    %16 = arith.mulf %1, %7 : vector<8x256xf32>
    %17 = vector.broadcast %15 : vector<8x1xf32> to vector<8x256xf32>
    %18 = arith.mulf %16, %17 : vector<8x256xf32>
    %c0_8 = arith.constant 0 : index
    %c0_9 = arith.constant 0 : index
    %19 = vector.load %arg4[%c0_8, %c0_9] : memref<8x256xf32, #tpu.memory_space<vmem>>, vector<8x256xf32>
    tpu.vector_store %arg4[%c0_8, %c0_9], %18 {strides = array<i32>} : memref<8x256xf32, #tpu.memory_space<vmem>>, vector<8x256xf32>,
    return
  }
  func.func @transform_0(%arg0: i32) -> (i32, i32) {
    %c0_i32 = arith.constant 0 : i32
    %c0_i32_0 = arith.constant 0 : i32
    return %arg0, %c0_i32 : i32, i32
  }
  func.func @transform_1(%arg0: i32) -> (i32, i32) {
    %c0_i32 = arith.constant 0 : i32
    %c0_i32_0 = arith.constant 0 : i32
    return %arg0, %c0_i32 : i32, i32
  }
  func.func @transform_2(%arg0: i32) -> (i32, i32) {
    %c0_i32 = arith.constant 0 : i32
    %c0_i32_0 = arith.constant 0 : i32
    return %arg0, %c0_i32 : i32, i32
  }
  func.func @transform_3(%arg0: i32) -> (i32, i32) {
    %c0_i32 = arith.constant 0 : i32
    %c0_i32_0 = arith.constant 0 : i32
    return %arg0, %c0_i32 : i32, i32
  }
}

</mosaic_0001>

<bundles_post_ra>
// kernel: tile.8
= control target key start
LH: loop header
LB: loop body
LE: loop exit
PB: predicated region body
PF: predicated region fallthrough
CT: control target
= control target key end

     0   :  { %s22_s0 = inlined_call_operand.vmem [shape: f32[4], index: 0, kind: input, shape index: {}]   ;;  %s23_s1 = inlined_call_operand.vmem [shape: f32[2,4], index: 1, kind: output, shape index: {}]  }
   0x1   :  { %v4_v0 = vld [vmem:[%s22_s0] ss:$0 sm:$0xff] }
   0x2   :  { %5 = vst [vmem:[%s23_s1] sm:$0x3] %v4_v0 }

// kernel: tile.0
= control target key start
LH: loop header
LB: loop body
LE: loop exit
PB: predicated region body
PF: predicated region fallthrough
CT: control target
= control target key end

     0   :  { %s34_s8 = smov 125   ;;  %vm7_vm0 = vcmask 7168   ;;  %s35_s11 = smov 126   ;;  %s61_s0 = inlined_call_operand.vmem [shape: f32[2,4], index: 0, kind: input, shape index: {}]   ;;  %s62_s1 = inlined_call_operand.vmem [shape: f32[8,1], index: 1, kind: output, shape index: {}]  }
   0x1   :  { %v4_v0 = vld [vmem:[%s61_s0] sm:$0x3]  ;;  %s33_s0 = smov 127  }
   0x2   :  { %5 = vst [vmem:[#allocation0] sm:$0x3] %v4_v0 }
   0x9   :  { %v9_v1 = vld [vmem:[#allocation0] sm:$0x3]  }
   0xa   :  { %v21_v2 = vld [vmem:[#allocation0] sm:$0x3]   ;;  %10 = vrot.lane.b32.xlu0 %v9_v1, %s33_s0 }
   0xb   :  { %22 = vrot.lane.b32.xlu1 %v21_v2, %s34_s8  ;;  %v6_v3 = vld [vmem:[#allocation0] sm:$0x3]  }
   0xc   :  { %v15_v4 = vld [vmem:[#allocation0] sm:$0x3]   ;;  %8 = vst.msk [vmem:[%s62_s1] ss:$4 sm:$0x3] %vm7_vm0, %v6_v3  }
   0xe   :  { %16 = vrot.lane.b32.xlu0 %v15_v4, %s35_s11 }
  0x7c   :  { %v11_v5 = vpop.permute.xlu0 %10  }
  0x7d   :  { %v23_v6 = vpop.permute.xlu1 %22   ;;  %27 = vst.msk [vmem:[%s62_s1 + $0x1] ss:$4 sm:$0x3] %vm7_vm0, %v11_v5  }
  0x7e   :  { %29 = vst.msk [vmem:[%s62_s1 + $0x3] ss:$4 sm:$0x3] %vm7_vm0, %v23_v6  }
  0x80   :  { %v17_v7 = vpop.permute.xlu0 %16  }
  0x81   :  { %28 = vst.msk [vmem:[%s62_s1 + $0x2] ss:$4 sm:$0x3] %vm7_vm0, %v17_v7  }

// kernel: _dfs_single_impl.1
= control target key start
LH: loop header
LB: loop body
LE: loop exit
PB: predicated region body
PF: predicated region fallthrough
CT: control target
= control target key end

     0   :  { %v62_v12 = vmov 0   ;;  %s104_s1 = inlined_call_operand.vmem [shape: f32[8,256], index: 1, kind: input, shape index: {}]   ;;  %s105_s2 = inlined_call_operand.vmem [shape: f32[8,1], index: 2, kind: input, shape index: {}]   ;;  %s106_s0 = inlined_call_operand.vmem [shape: f32[8,256], index: 0, kind: input, shape index: {}]   ;;  %s107_s3 = inlined_call_operand.vmem [shape: f32[8,256], index: 3, kind: output, shape index: {}]  }
   0x1   :  { %v14_v0 = vld [vmem:[%s104_s1] sm:$0xff]  ;;  %v15_v1 = vld [vmem:[%s104_s1 + $0x8] sm:$0xff]  ;;  %54 = vset.pattern.permute.xlu1 %v62_v12  ;;  %55 = vset.pattern.permute.xlu0 %v62_v12 }
   0x2   :  { %v19_v2 = vmax.f32 %v14_v0, %v15_v1  ;;  %v31_v3 = vadd.f32 %v15_v1, %v14_v0  ;;  %v18_v16 = vld [vmem:[%s105_s2] sm:$0xff]  ;;  %v17_v21 = vld [vmem:[%s106_s0 + $0x8] sm:$0xff] }
   0x3   :  { %v16_v20 = vld [vmem:[%s106_s0] sm:$0xff] }
   0x4   :  { %20 = vmax.xlane.f32.xlu0 %v19_v2  ;;  %32 = vadd.xlane.f32.xlu1 %v31_v3 }
  0x91   :  { %v21_v4 = vpop.xlane.xlu0 %20  ;;  %v33_v14 = vpop.xlane.xlu1 %32 }
  0x92   :  { %v22_v5 = vsub.f32 %v14_v0, %v21_v4  ;;  %v23_v6 = vsub.f32 %v15_v1, %v21_v4  ;;  %v34_v15 = vmul.f32 0.00390625, %v33_v14 }
  0x94   :  { %v24_v7 = vmul.f32 1.442695, %v22_v5  ;;  %v26_v8 = vmul.f32 1.442695, %v23_v6  ;;  %v35_v17 = vadd.f32 %v34_v15, %v18_v16 }
  0x96   :  { %56 = vpow2.f32 %v24_v7 }
  0x97   :  { %58 = vpow2.f32 %v26_v8 }
  0xa0   :  { %v57_v9 = vpop.eup %56 }
  0xa1   :  { %v59_v10 = vpop.eup %58  ;;  %v38_v22 = vmul.f32 %v57_v9, %v16_v20 }
  0xa2   :  { %v28_v11 = vadd.f32 %v59_v10, %v57_v9  ;;  %v39_v23 = vmul.f32 %v59_v10, %v17_v21 }
  0xa4   :  { %29 = vadd.xlane.f32.xlu0 %v28_v11 }
 0x131   :  { %v30_v13 = vpop.xlane.xlu0 %29 }
 0x132   :  { %60 = vrcp.f32 %v30_v13 }
 0x13c   :  { %v61_v18 = vpop.eup %60 }
 0x13d   :  { %v37_v19 = vmul.f32 %v61_v18, %v35_v17 }
 0x13f   :  { %42 = vperm.xlu1 %54, %v37_v19  }
 0x1be   :  { %v43_v24 = vpop.permute.xlu1 %42 }
 0x1bf   :  { %v45_v25 = vmul.f32 %v43_v24, %v38_v22  ;;  %v46_v26 = vmul.f32 %v43_v24, %v39_v23 }
 0x1c1   :  { %47 = vst [vmem:[%s107_s3] sm:$0xff] %v45_v25  ;;  %48 = vst [vmem:[%s107_s3 + $0x8] sm:$0xff] %v46_v26 }

</bundles_post_ra>
